<compile_context>
chip_gen: v6e
topology: v6e:2x2x1
jax: 0.10.0
libtpu: 0.0.40
codegen_flags: <defaults>
</compile_context>

<pallas_src>
import jax
import jax.numpy as jnp
from jax.experimental import pallas as pl
from jax.experimental.pallas import tpu as pltpu

NORM_EPS = 1e-12   # F.normalize default eps
LANE = 128
NEG_BIG = -1e30    # finite "-inf" so masked 0*(-big) stays 0 (no NaN)


# ----------------------------------------------------------------------------
# small hardware-aware helpers
# ----------------------------------------------------------------------------
def _preferred_block_b():
    # MXU-native M per generation: 128 on v5e (4x128x128), 256 on v6e/v7x (2x256x256).
    try:
        kind = jax.devices()[0].device_kind.lower()
        if "v5 lite" in kind or "v5e" in kind or "v5litepod" in kind:
            return 128
    except Exception:
        pass
    return 256


def _vmem_limit_bytes():
    # Generation-aware VMEM budget (v7x: 64 MiB physical -> ~48 MiB; v5e/v6e: 128 MiB).
    try:
        cap = pltpu.get_tpu_info().vmem_capacity_bytes
        return int(min(cap * 3 // 4, 100 * 1024 * 1024))
    except Exception:
        return 32 * 1024 * 1024


def _pick_block_b(batch, preferred):
    blk = min(preferred, batch)
    while blk > 8 and batch % blk != 0:
        blk //= 2
    if batch % blk != 0:
        blk = batch          # single full-batch block (block dim == full dim is legal)
    return blk


# ----------------------------------------------------------------------------
# Kernel A: Linear -> Linear -> L2 normalize  (vision/text projection heads)
# ----------------------------------------------------------------------------
def _proj_norm_kernel(x_ref, w1_ref, b1_ref, w2_ref, b2_ref, o_ref):
    # Both linears on the MXU with bf16 operands, f32 accumulation.
    h = jnp.dot(x_ref[...].astype(jnp.bfloat16), w1_ref[...].astype(jnp.bfloat16),
                preferred_element_type=jnp.float32) + b1_ref[...]
    z = jnp.dot(h.astype(jnp.bfloat16), w2_ref[...].astype(jnp.bfloat16),
                preferred_element_type=jnp.float32) + b2_ref[...]
    # F.normalize(z, dim=-1): z / max(||z||, eps) == z * rsqrt(max(||z||^2, eps^2)) (EUP)
    ssq = jnp.sum(z * z, axis=-1, keepdims=True)
    o_ref[...] = (z * jax.lax.rsqrt(jnp.maximum(ssq, NORM_EPS * NORM_EPS))).astype(o_ref.dtype)


def proj_normalize(x, w1, b1, w2, b2, *, block_b=None):
    """F.normalize(combine_proj(proj(x)), dim=-1) for x: (B, in_dim)."""
    B, in_dim = x.shape
    hid = w1.shape[1]
    out = w2.shape[1]
    block_b = _pick_block_b(B, block_b if block_b is not None else _preferred_block_b())

    grid = (B // block_b,)
    flops = 2 * B * (in_dim * hid + hid * out) + 4 * B * out
    bytes_acc = 4 * (B * in_dim + in_dim * hid + hid + hid * out + out + B * out)

    return pl.pallas_call(
        _proj_norm_kernel,
        out_shape=jax.ShapeDtypeStruct((B, out), jnp.float32),
        grid_spec=pltpu.PrefetchScalarGridSpec(
            num_scalar_prefetch=0,
            grid=grid,
            in_specs=[
                pl.BlockSpec((block_b, in_dim), lambda i: (i, 0)),   # x tile (pipelined)
                pl.BlockSpec((in_dim, hid), lambda i: (0, 0)),       # W1 (resident)
                pl.BlockSpec((1, hid), lambda i: (0, 0)),            # b1
                pl.BlockSpec((hid, out), lambda i: (0, 0)),          # W2 (resident)
                pl.BlockSpec((1, out), lambda i: (0, 0)),            # b2
            ],
            out_specs=pl.BlockSpec((block_b, out), lambda i: (i, 0)),
        ),
        compiler_params=pltpu.CompilerParams(
            dimension_semantics=("parallel",),
            vmem_limit_bytes=_vmem_limit_bytes(),
        ),
        cost_estimate=pl.CostEstimate(
            flops=flops, transcendentals=B, bytes_accessed=bytes_acc),
    )(x, w1, b1, w2, b2)


# ----------------------------------------------------------------------------
# Kernel B: fused similarity + momentum soft-target cross-entropy (per-row loss)
#
#   loss_i = -sum_j log_softmax(sim)_ij * (alpha*softmax(sim_m)_ij + (1-alpha)*onehot_ij)
#          =  lse_i(sim) - alpha * sum_j softmax(sim_m)_ij * sim_ij - (1-alpha) * sim_ii
#
# Grid = (batch tiles [parallel], N tiles [arbitrary]).  One fused MXU call per step:
# [feat_block ; feat_m_block] (2*block_b, D) @ feat_all tile (D, block_n), online
# softmax stats accumulated in VMEM scratch, per-row loss written on the last N tile.
# ----------------------------------------------------------------------------
def _ita_loss_kernel(scal_ref, nvalid_ref, lhs_ref, featall_ref, o_ref,
                     m_sc, l_sc, mm_sc, lm_sc, a_sc, d_sc):
    j = pl.program_id(1)
    inv_temp = scal_ref[0]
    alpha = scal_ref[1]
    n_valid = nvalid_ref[0]
    bm = lhs_ref.shape[0] // 2          # rows of sim (and of sim_m)
    bn = featall_ref.shape[1]

    @pl.when(j == 0)
    def _():
        m_sc[...] = jnp.full(m_sc.shape, NEG_BIG, jnp.float32)
        mm_sc[...] = jnp.full(mm_sc.shape, NEG_BIG, jnp.float32)
        l_sc[...] = jnp.zeros(l_sc.shape, jnp.float32)
        lm_sc[...] = jnp.zeros(lm_sc.shape, jnp.float32)
        a_sc[...] = jnp.zeros(a_sc.shape, jnp.float32)
        d_sc[...] = jnp.zeros(d_sc.shape, jnp.float32)

    # One fused MXU call: bf16 in, f32 accumulate, then split online/momentum rows.
    sims = jnp.dot(lhs_ref[...], featall_ref[...],
                   preferred_element_type=jnp.float32) * inv_temp
    sim, sim_m = sims[:bm], sims[bm:]

    # Global row/col indices: mask padded columns, locate the one-hot diagonal.
    col0 = j * bn
    cols = jax.lax.broadcasted_iota(jnp.int32, (bm, bn), 1) + col0
    rows = jax.lax.broadcasted_iota(jnp.int32, (bm, bn), 0) + pl.program_id(0) * bm
    valid = cols < n_valid
    sim = jnp.where(valid, sim, NEG_BIG)
    sim_m = jnp.where(valid, sim_m, NEG_BIG)

    # (1-alpha) one-hot term: accumulate the diagonal logit (N-tile aware).
    d_sc[...] += jnp.sum(jnp.where((rows == cols) & valid, sim, 0.0),
                         axis=-1, keepdims=True)

    # Online log-sum-exp of sim.
    m_new = jnp.maximum(m_sc[...], jnp.max(sim, axis=-1, keepdims=True))
    l_sc[...] = (l_sc[...] * jnp.exp(m_sc[...] - m_new)
                 + jnp.sum(jnp.exp(sim - m_new), axis=-1, keepdims=True))
    m_sc[...] = m_new

    # Online softmax(sim_m)-weighted sum of sim (the alpha soft-target term).
    mm_new = jnp.maximum(mm_sc[...], jnp.max(sim_m, axis=-1, keepdims=True))
    corr = jnp.exp(mm_sc[...] - mm_new)
    p = jnp.exp(sim_m - mm_new)
    lm_sc[...] = lm_sc[...] * corr + jnp.sum(p, axis=-1, keepdims=True)
    a_sc[...] = a_sc[...] * corr + jnp.sum(p * sim, axis=-1, keepdims=True)
    mm_sc[...] = mm_new

    @pl.when(j == pl.num_programs(1) - 1)
    def _():
        lse = m_sc[...] + jnp.log(l_sc[...])
        soft = a_sc[...] * pl.reciprocal(lm_sc[...], approx=True)   # EUP reciprocal
        loss_rows = lse - alpha * soft - (1.0 - alpha) * d_sc[...]  # (bm, 1)
        # lane-dense store (block_b, 128)
        o_ref[...] = jnp.broadcast_to(loss_rows, o_ref.shape).astype(o_ref.dtype)


def ita_loss_rows(feat, feat_m, feat_all, temp, alpha, *, block_b=None, block_n=None):
    """Per-row soft-target CE loss; returns shape (B,)."""
    B, D = feat.shape
    N = feat_all.shape[1]
    block_b = _pick_block_b(B, block_b if block_b is not None else _preferred_block_b())
    if block_n is None:
        block_n = min(2048, pl.cdiv(N, LANE) * LANE)   # production: 2K-column N tiles
    n_pad = pl.cdiv(N, block_n) * block_n
    if n_pad != N:
        feat_all = jnp.pad(feat_all, ((0, 0), (0, n_pad - N)))

    nb = B // block_b
    # Interleave feat / feat_m per batch tile -> one (2*block_b, D) MXU LHS per grid step.
    lhs = jnp.concatenate(
        [feat.reshape(nb, block_b, D), feat_m.reshape(nb, block_b, D)], axis=1
    ).reshape(2 * B, D).astype(jnp.bfloat16)
    rhs = feat_all.astype(jnp.bfloat16)

    inv_temp = jnp.asarray(1.0 / temp, jnp.float32).reshape(())
    scalars = jnp.stack([inv_temp, jnp.asarray(alpha, jnp.float32)])   # (2,) f32, SMEM
    nvalid = jnp.asarray([N], jnp.int32)                               # (1,) i32, SMEM

    grid = (nb, n_pad // block_n)
    flops = 4 * B * D * n_pad + 12 * B * n_pad
    bytes_acc = 2 * (2 * B * D + D * n_pad) + 4 * B * LANE + 12

    out = pl.pallas_call(
        _ita_loss_kernel,
        out_shape=jax.ShapeDtypeStruct((B, LANE), jnp.float32),
        grid_spec=pltpu.PrefetchScalarGridSpec(
            num_scalar_prefetch=0,
            grid=grid,
            in_specs=[
                pl.BlockSpec(memory_space=pltpu.MemorySpace.SMEM),        # [1/temp, alpha]
                pl.BlockSpec(memory_space=pltpu.MemorySpace.SMEM),        # [n_valid]
                pl.BlockSpec((2 * block_b, D), lambda i, j: (i, 0)),      # stacked LHS tile
                pl.BlockSpec((D, block_n), lambda i, j: (0, j)),          # feat_all N tile
            ],
            out_specs=pl.BlockSpec((block_b, LANE), lambda i, j: (i, 0)),
            scratch_shapes=[pltpu.VMEM((block_b, 1), jnp.float32)] * 6,
        ),
        compiler_params=pltpu.CompilerParams(
            dimension_semantics=("parallel", "arbitrary"),
            vmem_limit_bytes=_vmem_limit_bytes(),
        ),
        cost_estimate=pl.CostEstimate(
            flops=flops, transcendentals=2 * B * n_pad + 4 * B, bytes_accessed=bytes_acc),
    )(scalars, nvalid, lhs, rhs)
    return out[:, 0]


# ----------------------------------------------------------------------------
# Pure-JAX references (for correctness check)
# ----------------------------------------------------------------------------
def ref_proj_norm(x, w1, b1, w2, b2):
    z = (x @ w1 + b1) @ w2 + b2
    n = jnp.sqrt(jnp.sum(z * z, axis=-1, keepdims=True))
    return z / jnp.maximum(n, NORM_EPS)


def ref_loss_rows(feat, feat_m, feat_all, temp, alpha):
    sim = feat @ feat_all / temp
    sim_m = feat_m @ feat_all / temp
    onehot = jnp.eye(feat.shape[0], feat_all.shape[1], dtype=jnp.float32)
    targets = alpha * jax.nn.softmax(sim_m, axis=1) + (1.0 - alpha) * onehot
    return -jnp.sum(jax.nn.log_softmax(sim, axis=1) * targets, axis=1)


if __name__ == "__main__":
    # Small shapes consistent with the module's contrastive head
    # (feature dims kept as multiples of 128 for lane density).
    B = 16              # batch
    VISION_WIDTH = 256  # vision_width (stand-in for 768)
    TEXT_WIDTH = 256    # text_width
    EMBED_DIM = 128     # config['embed_dim']
    QUEUE = 128         # config['queue_size']
    MOMENTUM = 0.995    # config['momentum']
    ALPHA = 0.4
    TEMP = 0.07         # config['temp']
    BLOCK_N = 128       # small N tile so the online-softmax N grid is exercised (2 tiles)

    key = jax.random.PRNGKey(0)
    ks = jax.random.split(key, 20)

    def linear_init(kw, kb, fan_in, fan_out):
        lim = 1.0 / fan_in ** 0.5
        w = jax.random.uniform(kw, (fan_in, fan_out), jnp.float32, -lim, lim)
        b = jax.random.uniform(kb, (1, fan_out), jnp.float32, -lim, lim)
        return w, b

    # online projection heads
    vp_w, vp_b = linear_init(ks[0], ks[1], VISION_WIDTH, EMBED_DIM)   # vision_proj
    cvp_w, cvp_b = linear_init(ks[2], ks[3], EMBED_DIM, EMBED_DIM)    # combine_vision_proj
    tp_w, tp_b = linear_init(ks[4], ks[5], TEXT_WIDTH, EMBED_DIM)     # text_proj
    ctp_w, ctp_b = linear_init(ks[6], ks[7], EMBED_DIM, EMBED_DIM)    # combine_text_proj
    # momentum copies (copy_params -> identical at init)
    vp_w_m, vp_b_m = vp_w, vp_b
    cvp_w_m, cvp_b_m = cvp_w, cvp_b
    tp_w_m, tp_b_m = tp_w, tp_b

    temp = jnp.float32(TEMP)

    # Encoder [CLS] outputs stand in for the transformer encoders.
    # TODO(synk): ViT-B/16 visual_encoder and BERT text/fusion encoder are full
    #             pretrained transformers and are not translated to Pallas here.
    tar_cls = jax.random.normal(ks[8], (B, VISION_WIDTH), jnp.float32)
    ref_cls_m = jax.random.normal(ks[9], (B, VISION_WIDTH), jnp.float32)
    tar_cls_m = jax.random.normal(ks[10], (B, VISION_WIDTH), jnp.float32)
    fusion_cls = jax.random.normal(ks[11], (B, TEXT_WIDTH), jnp.float32)
    fusion_cls_m = jax.random.normal(ks[12], (B, TEXT_WIDTH), jnp.float32)

    image_queue = jax.random.normal(ks[13], (EMBED_DIM, QUEUE), jnp.float32)
    fusion_queue = jax.random.normal(ks[14], (EMBED_DIM, QUEUE), jnp.float32)
    image_queue = image_queue / jnp.maximum(
        jnp.linalg.norm(image_queue, axis=0, keepdims=True), NORM_EPS)
    fusion_queue = fusion_queue / jnp.maximum(
        jnp.linalg.norm(fusion_queue, axis=0, keepdims=True), NORM_EPS)
    img_queue_ptr = jnp.zeros((1,), jnp.int32)
    fusion_queue_ptr = jnp.zeros((1,), jnp.int32)

    # ---------------- forward (FashionFINE.forward semantics) ----------------
    # with torch.no_grad(): self.temp.clamp_(0.001, 0.5)
    temp_c = jnp.clip(temp, 0.001, 0.5)

    # _momentum_update() on the projection heads
    mom = lambda p_m, p: MOMENTUM * p_m + (1.0 - MOMENTUM) * p
    vp_w_m, vp_b_m = mom(vp_w_m, vp_w), mom(vp_b_m, vp_b)
    cvp_w_m, cvp_b_m = mom(cvp_w_m, cvp_w), mom(cvp_b_m, cvp_b)
    tp_w_m, tp_b_m = mom(tp_w_m, tp_w), mom(tp_b_m, tp_b)

    # online features (Kernel A)
    tar_image_feat = proj_normalize(tar_cls, vp_w, vp_b, cvp_w, cvp_b)
    fusion_feat = proj_normalize(fusion_cls, tp_w, tp_b, ctp_w, ctp_b)

    # momentum features (Kernel A with momentum weights)
    # ref/tar momentum vision projections share weights -> one batched launch.
    vis_m_feat = proj_normalize(jnp.concatenate([ref_cls_m, tar_cls_m], axis=0),
                                vp_w_m, vp_b_m, cvp_w_m, cvp_b_m)
    ref_image_feat_m, tar_image_feat_m = vis_m_feat[:B], vis_m_feat[B:]
    # NB: the reference module uses the *online* combine_text_proj on text_proj_m output.
    fusion_feat_m = proj_normalize(fusion_cls_m, tp_w_m, tp_b_m, ctp_w, ctp_b)

    tar_image_feat_all = jnp.concatenate(
        [tar_image_feat_m.T, ref_image_feat_m.T, image_queue], axis=1)   # (D, 2B+Q)
    fusion_feat_all = jnp.concatenate([fusion_feat_m.T, fusion_queue], axis=1)  # (D, B+Q)

    # fused contrastive soft-target CE (Kernel B, N-tiled online softmax)
    loss_i2f_rows = ita_loss_rows(tar_image_feat, tar_image_feat_m, fusion_feat_all,
                                  temp_c, ALPHA, block_n=BLOCK_N)
    loss_f2i_rows = ita_loss_rows(fusion_feat, fusion_feat_m, tar_image_feat_all,
                                  temp_c, ALPHA, block_n=BLOCK_N)
    loss_ita = (loss_i2f_rows.mean() + loss_f2i_rows.mean()) / 2.0

    # _dequeue_and_enqueue_fusion (concat_all_gather == identity on one device)
    image_feats = jnp.concatenate([tar_image_feat_m, ref_image_feat_m], axis=0)
    image_queue_new = jax.lax.dynamic_update_slice(
        image_queue, image_feats.T, (0, img_queue_ptr[0]))
    fusion_queue_new = jax.lax.dynamic_update_slice(
        fusion_queue, fusion_feat_m.T, (0, fusion_queue_ptr[0]))
    img_queue_ptr = (img_queue_ptr + image_feats.shape[0]) % QUEUE
    fusion_queue_ptr = (fusion_queue_ptr + fusion_feat_m.shape[0]) % QUEUE

    loss_ita = jax.block_until_ready(loss_ita)
    jax.block_until_ready((image_queue_new, fusion_queue_new))

    # ---------------- correctness check vs pure-JAX reference ----------------
    r_tar_feat = ref_proj_norm(tar_cls, vp_w, vp_b, cvp_w, cvp_b)
    r_fusion_feat = ref_proj_norm(fusion_cls, tp_w, tp_b, ctp_w, ctp_b)
    r_ref_feat_m = ref_proj_norm(ref_cls_m, vp_w_m, vp_b_m, cvp_w_m, cvp_b_m)
    r_tar_feat_m = ref_proj_norm(tar_cls_m, vp_w_m, vp_b_m, cvp_w_m, cvp_b_m)
    r_fusion_feat_m = ref_proj_norm(fusion_cls_m, tp_w_m, tp_b_m, ctp_w, ctp_b)
    r_tar_all = jnp.concatenate([r_tar_feat_m.T, r_ref_feat_m.T, image_queue], axis=1)
    r_fus_all = jnp.concatenate([r_fusion_feat_m.T, fusion_queue], axis=1)
    r_loss = (ref_loss_rows(r_tar_feat, r_tar_feat_m, r_fus_all, temp_c, ALPHA).mean()
              + ref_loss_rows(r_fusion_feat, r_fusion_feat_m, r_tar_all, temp_c, ALPHA).mean()) / 2.0

    assert tar_image_feat.shape == (B, EMBED_DIM)
    assert loss_ita.shape == ()
    # tolerances loosened vs the f32 reference: the MXU now consumes bf16 operands
    assert jnp.allclose(tar_image_feat, r_tar_feat, atol=1e-2, rtol=1e-2), "feat mismatch"
    assert jnp.allclose(fusion_feat, r_fusion_feat, atol=1e-2, rtol=1e-2), "feat mismatch"
    assert jnp.allclose(loss_ita, r_loss, atol=1e-1, rtol=3e-2), "loss mismatch"
    assert bool(jnp.isfinite(loss_ita)), "non-finite loss"

    print("KERNEL_OK")
</pallas_src>

<mosaic_0001>
module attributes {stable_mosaic.version = 11 : i64} {
  func.func @_proj_norm_kernel(%arg0: i32, %arg1: memref<16x256xf32, #tpu.memory_space<vmem>>, %arg2: memref<256x128xf32, #tpu.memory_space<vmem>>, %arg3: memref<1x128xf32, #tpu.memory_space<vmem>>, %arg4: memref<128x128xf32, #tpu.memory_space<vmem>>, %arg5: memref<1x128xf32, #tpu.memory_space<vmem>>, %arg6: memref<16x128xf32, #tpu.memory_space<vmem>>) attributes {dimension_semantics = [#tpu.dimension_semantics<parallel>], iteration_bounds = array<i64: 1>, scalar_prefetch = 0 : i64, scratch_operands = 0 : i64, tpu.core_type = #tpu.core_type<tc>, window_params = [{transform_indices = @transform_0, window_bounds = array<i64: 16, 256>}, {pipeline_mode = #tpu.pipeline_mode<synchronous>, transform_indices = @transform_1, window_bounds = array<i64: 256, 128>}, {pipeline_mode = #tpu.pipeline_mode<synchronous>, transform_indices = @transform_2, window_bounds = array<i64: 1, 128>}, {pipeline_mode = #tpu.pipeline_mode<synchronous>, transform_indices = @transform_3, window_bounds = array<i64: 128, 128>}, {pipeline_mode = #tpu.pipeline_mode<synchronous>, transform_indices = @transform_4, window_bounds = array<i64: 1, 128>}, {transform_indices = @transform_5, window_bounds = array<i64: 16, 128>}]} {
    %c0 = arith.constant 0 : index
    %c0_0 = arith.constant 0 : index
    %0 = vector.load %arg1[%c0, %c0_0] : memref<16x256xf32, #tpu.memory_space<vmem>>, vector<16x256xf32>
    %1 = arith.truncf %0 : vector<16x256xf32> to vector<16x256xbf16>
    %c0_1 = arith.constant 0 : index
    %c0_2 = arith.constant 0 : index
    %2 = vector.load %arg2[%c0_1, %c0_2] : memref<256x128xf32, #tpu.memory_space<vmem>>, vector<256x128xf32>
    %3 = arith.truncf %2 : vector<256x128xf32> to vector<256x128xbf16>
    %cst = arith.constant dense<0.000000e+00> : vector<16x128xf32>
    %4 = tpu.matmul %1, %3, %cst {dimension_numbers = #tpu.dot_dimension_numbers<[1], [0], [0], [1], [0, 0, 1, 1], [], []>} : vector<16x256xbf16>, vector<256x128xbf16>, vector<16x128xf32> -> vector<16x128xf32>
    %c0_3 = arith.constant 0 : index
    %c0_4 = arith.constant 0 : index
    %5 = vector.load %arg3[%c0_3, %c0_4] : memref<1x128xf32, #tpu.memory_space<vmem>>, vector<1x128xf32>
    %6 = vector.broadcast %5 : vector<1x128xf32> to vector<16x128xf32>
    %7 = arith.addf %4, %6 : vector<16x128xf32>
    %8 = arith.truncf %7 : vector<16x128xf32> to vector<16x128xbf16>
    %c0_5 = arith.constant 0 : index
    %c0_6 = arith.constant 0 : index
    %9 = vector.load %arg4[%c0_5, %c0_6] : memref<128x128xf32, #tpu.memory_space<vmem>>, vector<128x128xf32>
    %10 = arith.truncf %9 : vector<128x128xf32> to vector<128x128xbf16>
    %cst_7 = arith.constant dense<0.000000e+00> : vector<16x128xf32>
    %11 = tpu.matmul %8, %10, %cst_7 {dimension_numbers = #tpu.dot_dimension_numbers<[1], [0], [0], [1], [0, 0, 1, 1], [], []>} : vector<16x128xbf16>, vector<128x128xbf16>, vector<16x128xf32> -> vector<16x128xf32>
    %c0_8 = arith.constant 0 : index
    %c0_9 = arith.constant 0 : index
    %12 = vector.load %arg5[%c0_8, %c0_9] : memref<1x128xf32, #tpu.memory_space<vmem>>, vector<1x128xf32>
    %13 = vector.broadcast %12 : vector<1x128xf32> to vector<16x128xf32>
    %14 = arith.addf %11, %13 : vector<16x128xf32>
    %15 = arith.mulf %14, %14 : vector<16x128xf32>
    %cst_10 = arith.constant dense<0.000000e+00> : vector<16xf32>
    %16 = vector.multi_reduction <add>, %15, %cst_10 [1] : vector<16x128xf32> to vector<16xf32>
    %17 = vector.shape_cast %16 : vector<16xf32> to vector<16x1xf32>
    %cst_11 = arith.constant 1.000000e-24 : f32
    %18 = vector.broadcast %cst_11 : f32 to vector<16x1xf32>
    %19 = arith.maximumf %17, %18 : vector<16x1xf32>
    %20 = math.rsqrt %19 : vector<16x1xf32>
    %21 = vector.broadcast %20 : vector<16x1xf32> to vector<16x128xf32>
    %22 = arith.mulf %14, %21 : vector<16x128xf32>
    %c0_12 = arith.constant 0 : index
    %c0_13 = arith.constant 0 : index
    %23 = vector.load %arg6[%c0_12, %c0_13] : memref<16x128xf32, #tpu.memory_space<vmem>>, vector<16x128xf32>
    tpu.vector_store %arg6[%c0_12, %c0_13], %22 {strides = array<i32>} : memref<16x128xf32, #tpu.memory_space<vmem>>, vector<16x128xf32>,
    return
  }
  func.func @transform_0(%arg0: i32) -> (i32, i32) {
    %c0_i32 = arith.constant 0 : i32
    %c0_i32_0 = arith.constant 0 : i32
    return %arg0, %c0_i32 : i32, i32
  }
  func.func @transform_1(%arg0: i32) -> (i32, i32) {
    %c0_i32 = arith.constant 0 : i32
    %c0_i32_0 = arith.constant 0 : i32
    %c0_i32_1 = arith.constant 0 : i32
    return %c0_i32, %c0_i32_0 : i32, i32
  }
  func.func @transform_2(%arg0: i32) -> (i32, i32) {
    %c0_i32 = arith.constant 0 : i32
    %c0_i32_0 = arith.constant 0 : i32
    %c0_i32_1 = arith.constant 0 : i32
    return %c0_i32, %c0_i32_0 : i32, i32
  }
  func.func @transform_3(%arg0: i32) -> (i32, i32) {
    %c0_i32 = arith.constant 0 : i32
    %c0_i32_0 = arith.constant 0 : i32
    %c0_i32_1 = arith.constant 0 : i32
    return %c0_i32, %c0_i32_0 : i32, i32
  }
  func.func @transform_4(%arg0: i32) -> (i32, i32) {
    %c0_i32 = arith.constant 0 : i32
    %c0_i32_0 = arith.constant 0 : i32
    %c0_i32_1 = arith.constant 0 : i32
    return %c0_i32, %c0_i32_0 : i32, i32
  }
  func.func @transform_5(%arg0: i32) -> (i32, i32) {
    %c0_i32 = arith.constant 0 : i32
    %c0_i32_0 = arith.constant 0 : i32
    return %arg0, %c0_i32 : i32, i32
  }
}

</mosaic_0001>

<bundles_post_ra>
// kernel: tpu_custom_call.1
= control target key start
LH: loop header
LB: loop body
LE: loop exit
PB: predicated region body
PF: predicated region fallthrough
CT: control target
= control target key end

     0   :  { %10 = vsyncpa [#allocation3], 0  ;;  %s499_s0 = inlined_call_operand.hbm [shape: f32[16,256], index: 0, kind: input, shape index: {}]   ;;  %s500_s1 = inlined_call_operand.hbm [shape: f32[256,128], index: 1, kind: input, shape index: {}]   ;;  %s501_s2 = inlined_call_operand.vmem [shape: f32[1,128], index: 2, kind: input, shape index: {}]   ;;  %s502_s3 = inlined_call_operand.hbm [shape: f32[128,128], index: 3, kind: input, shape index: {}]   ;;  %s503_s4 = inlined_call_operand.vmem [shape: f32[1,128], index: 4, kind: input, shape index: {}]   ;;  %s504_s5 = inlined_call_operand.hbm [shape: f32[16,128], index: 5, kind: output, shape index: {}]  }
   0x1   :  { %11 = vsyncpa [#allocation6], 0 }
   0x2   :  { %12 = vsyncpa [#allocation4], 0  ;;  %s423_s18 = smov [#allocation5]  }
   0x3   :  { %s30_s19 = sshll.u32 %s423_s18, 4  ;;  %s31_s19 = int_to_ptr.vmem [resolvable:$true] %s30_s19 }
   0x4   :  { %s345_s20 = scalar_lea.vmem %s31_s19, 4096  ;;  %p350_p1 = scmp.lt.s32.totalorder %s31_s19, %s31_s19 }
   0x5   :  { %p346_p0 = scmp.ne.s32.totalorder %s31_s19, %s345_s20  ;;  %p351_p2 = scmp.lt.s32.totalorder %s345_s20, %s345_s20 }
   0x7   :  { %p352_p3 = por %p351_p2, %p350_p1 }
   0x9   :  { %p353_p4 = pnand %p352_p3, %p346_p0 }
   0xb   :  { %356 = shalt.err (!%p353_p4)
}
   0xc   :  { %s424_s21 = smov 128   ;;  %s425_s22 = smov 8  }
   0xd   :  { %36 = dma.hbm_to_vmem [thread:$0]  %s500_s1, 4096, %s31_s19, [#allocation6], %s424_s21, %s424_s21, %s425_s22  }
   0xe   :  { %s426_s25 = smov [#allocation2]  }
   0xf   :  { %s18_s26 = sshll.u32 %s426_s25, 4  ;;  %s19_s26 = int_to_ptr.vmem [resolvable:$true] %s18_s26 }
  0x10   :  { %s365_s27 = scalar_lea.vmem %s19_s26, 512  ;;  %p370_p6 = scmp.lt.s32.totalorder %s19_s26, %s19_s26 }
  0x11   :  { %p366_p5 = scmp.ne.s32.totalorder %s19_s26, %s365_s27  ;;  %p371_p7 = scmp.lt.s32.totalorder %s365_s27, %s365_s27 }
  0x13   :  { %p372_p8 = por %p371_p7, %p370_p6 }
  0x15   :  { %p373_p9 = pnand %p372_p8, %p366_p5 }
  0x17   :  { %376 = shalt.err (!%p373_p9)
}
  0x18   :  { %s427_s28 = smov 256   ;;  %s428_s29 = smov 16  }
  0x19   :  { %24 = dma.hbm_to_vmem [thread:$0]  %s499_s0, 512, %s19_s26, [#allocation3], %s427_s28, %s427_s28, %s428_s29  }
  0x1a   :  { %s429_s7 = smov [#allocation7]  }
  0x1b   :  { %s44_s8 = sshll.u32 %s429_s7, 4  ;;  %s45_s8 = int_to_ptr.vmem [resolvable:$true] %s44_s8 }
  0x1c   :  { %s385_s1 = scalar_lea.vmem %s45_s8, 2048  ;;  %p390_p11 = scmp.lt.s32.totalorder %s45_s8, %s45_s8 }
  0x1d   :  { %p386_p10 = scmp.ne.s32.totalorder %s45_s8, %s385_s1  ;;  %p391_p12 = scmp.lt.s32.totalorder %s385_s1, %s385_s1 }
  0x1f   :  { %p392_p13 = por %p391_p12, %p390_p11 }
  0x21   :  { %p393_p0 = pnand %p392_p13, %p386_p10 }
  0x23   :  { %396 = shalt.err (!%p393_p0)
}
  0x24   :  { %50 = dma.hbm_to_vmem [thread:$0]  %s502_s3, 2048, %s45_s8, [#allocation6], %s424_s21, %s424_s21, %s425_s22  }
  0x25   :  { %417 = dma.done.wait [#allocation3], 512  }
  0x26   :  { %418 = vsyncadd [#allocation3], 4294966784 }
  0x27   :  { %419 = dma.done.wait [#allocation6], 6144  }
  0x28   :  { %420 = vsyncadd [#allocation6], 4294961152  ;;  %v430_v0 = vmov 0.0   ;;  %v99_v1 = vld [vmem:[#allocation5 + $0xf0] sm:$0xff]  ;;  %v100_v2 = vld [vmem:[#allocation5 + $0xf8] sm:$0xff]  ;;  %vm431_vm0 = vmmov 0  }
  0x29   :  { %303 = vmatprep.subr.bf16.mxu1 %v430_v0  ;;  %v83_v3 = vld [vmem:[#allocation5 + $0x70] sm:$0xff]  ;;  %v116_v4 = vpack.c.bf16 %v100_v2, %v99_v1  ;;  %v84_v5 = vld [vmem:[#allocation5 + $0x78] sm:$0xff]  ;;  %v97_v6 = vld [vmem:[#allocation5 + $0xe0] sm:$0xff]  ;;  %319 = vmatprep.mubr.msk.bf16.mxu1 %vm431_vm0, %v430_v0 }
  0x2a   :  { %v98_v7 = vld [vmem:[#allocation5 + $0xe8] sm:$0xff]  ;;  %v108_v8 = vpack.c.bf16 %v84_v5, %v83_v3  ;;  %v81_v10 = vld [vmem:[#allocation5 + $0x60] sm:$0xff]  ;;  %v95_v12 = vld [vmem:[#allocation5 + $0xd0] sm:$0xff] }
  0x2b   :  { %v115_v9 = vpack.c.bf16 %v98_v7, %v97_v6  ;;  %v82_v11 = vld [vmem:[#allocation5 + $0x68] sm:$0xff]  ;;  %272 = vmatprep.subr.bf16.mxu0 %v116_v4  ;;  %v96_v13 = vld [vmem:[#allocation5 + $0xd8] sm:$0xff]  ;;  %v79_v16 = vld [vmem:[#allocation5 + $0x50] sm:$0xff] }
  0x2c   :  { %273 = vmatpush3.bf16.msra.mxu0 %v108_v8  ;;  %v107_v14 = vpack.c.bf16 %v82_v11, %v81_v10  ;;  %v114_v15 = vpack.c.bf16 %v96_v13, %v95_v12  ;;  %v80_v17 = vld [vmem:[#allocation5 + $0x58] sm:$0xff]  ;;  %v93_v18 = vld [vmem:[#allocation5 + $0xc0] sm:$0xff]  ;;  %v94_v19 = vld [vmem:[#allocation5 + $0xc8] sm:$0xff] }
  0x2d   :  { %274 = vmatprep.subr.bf16.mxu0 %v115_v9  ;;  %v106_v20 = vpack.c.bf16 %v80_v17, %v79_v16  ;;  %v113_v21 = vpack.c.bf16 %v94_v19, %v93_v18  ;;  %v77_v22 = vld [vmem:[#allocation5 + $0x40] sm:$0xff]  ;;  %v78_v23 = vld [vmem:[#allocation5 + $0x48] sm:$0xff]  ;;  %v91_v24 = vld [vmem:[#allocation5 + $0xb0] sm:$0xff] }
  0x2e   :  { %v92_v25 = vld [vmem:[#allocation5 + $0xb8] sm:$0xff]  ;;  %v64_v26 = vld [vmem:[#allocation2 + $0x8] sm:$0xff]  ;;  %v105_v28 = vpack.c.bf16 %v78_v23, %v77_v22  ;;  %v180_v30 = vld [vmem:[#allocation7 + $0x70] sm:$0xff] }
  0x2f   :  { %v66_v27 = vld [vmem:[#allocation2 + $0x18] sm:$0xff]  ;;  %v178_v32 = vld [vmem:[#allocation7 + $0x60] sm:$0xff]  ;;  %v112_v33 = vpack.c.bf16 %v92_v25, %v91_v24  ;;  %v75_v34 = vld [vmem:[#allocation5 + $0x30] sm:$0xff] }
  0x30   :  { %275 = vmatpush3.bf16.msra.mxu0 %v107_v14  ;;  %v68_v29 = vpack.c.bf16 %v66_v27, %v64_v26  ;;  %v181_v31 = vld [vmem:[#allocation7 + $0x78] sm:$0xff]  ;;  %v179_v37 = vld [vmem:[#allocation7 + $0x68] sm:$0xff]  ;;  %v89_v38 = vld [vmem:[#allocation5 + $0xa0] sm:$0xff] }
  0x31   :  { %276 = vmatprep.subr.bf16.mxu0 %v114_v15  ;;  %v76_v35 = vld [vmem:[#allocation5 + $0x38] sm:$0xff]  ;;  %v189_v36 = vpack.c.bf16 %v181_v31, %v180_v30  ;;  %v90_v39 = vld [vmem:[#allocation5 + $0xa8] sm:$0xff]  ;;  %v188_v40 = vpack.c.bf16 %v179_v37, %v178_v32  ;;  %v176_v42 = vld [vmem:[#allocation7 + $0x50] sm:$0xff] }
  0x32   :  { %156 = vmatprep.mubr.bf16.mxu0 %v68_v29  ;;  %v104_v41 = vpack.c.bf16 %v76_v35, %v75_v34  ;;  %v177_v43 = vld [vmem:[#allocation7 + $0x58] sm:$0xff]  ;;  %v111_v44 = vpack.c.bf16 %v90_v39, %v89_v38  ;;  %v73_v45 = vld [vmem:[#allocation5 + $0x20] sm:$0xff]  ;;  %v74_v46 = vld [vmem:[#allocation5 + $0x28] sm:$0xff] }
  0x33   :  { %304 = vmatpush3.bf16.msra.mxu1 %v189_v36  ;;  %v87_v47 = vld [vmem:[#allocation5 + $0x90] sm:$0xff]  ;;  %v88_v48 = vld [vmem:[#allocation5 + $0x98] sm:$0xff]  ;;  %v187_v49 = vpack.c.bf16 %v177_v43, %v176_v42  ;;  %v103_v50 = vpack.c.bf16 %v74_v46, %v73_v45  ;;  %v174_v51 = vld [vmem:[#allocation7 + $0x40] sm:$0xff] }
  0x34   :  { %277 = vmatpush3.bf16.msra.mxu0 %v106_v20  ;;  %305 = vmatprep.subr.bf16.mxu1 %v430_v0  ;;  %v175_v52 = vld [vmem:[#allocation7 + $0x48] sm:$0xff]  ;;  %v110_v53 = vpack.c.bf16 %v88_v48, %v87_v47  ;;  %v71_v54 = vld [vmem:[#allocation5 + $0x10] sm:$0xff]  ;;  %v72_v55 = vld [vmem:[#allocation5 + $0x18] sm:$0xff] }
  0x35   :  { %278 = vmatprep.subr.bf16.mxu0 %v113_v21  ;;  %v85_v56 = vld [vmem:[#allocation5 + $0x80] sm:$0xff]  ;;  %v86_v57 = vld [vmem:[#allocation5 + $0x88] sm:$0xff]  ;;  %v186_v58 = vpack.c.bf16 %v175_v52, %v174_v51  ;;  %v102_v59 = vpack.c.bf16 %v72_v55, %v71_v54  ;;  %v172_v60 = vld [vmem:[#allocation7 + $0x30] sm:$0xff] }
  0x36   :  { %v173_v61 = vld [vmem:[#allocation7 + $0x38] sm:$0xff]  ;;  %v109_v62 = vpack.c.bf16 %v86_v57, %v85_v56  ;;  %v69_v63 = vld [vmem:[#allocation5] sm:$0xff]  ;;  %v70_v1 = vld [vmem:[#allocation5 + $0x8] sm:$0xff] }
  0x37   :  { %306 = vmatpush3.bf16.msra.mxu1 %v188_v40  ;;  %v185_v2 = vpack.c.bf16 %v173_v61, %v172_v60  ;;  %v101_v3 = vpack.c.bf16 %v70_v1, %v69_v63  ;;  %v63_v4 = vld [vmem:[#allocation2] sm:$0xff]  ;;  %v65_v5 = vld [vmem:[#allocation2 + $0x10] sm:$0xff]  ;;  %v171_v8 = vld [vmem:[#allocation7 + $0x28] sm:$0xff] }
  0x38   :  { %279 = vmatpush3.bf16.msra.mxu0 %v105_v28  ;;  %307 = vmatprep.subr.bf16.mxu1 %v430_v0  ;;  %v67_v6 = vpack.c.bf16 %v65_v5, %v63_v4  ;;  %v170_v7 = vld [vmem:[#allocation7 + $0x20] sm:$0xff]  ;;  %v168_v10 = vld [vmem:[#allocation7 + $0x10] sm:$0xff]  ;;  %v169_v11 = vld [vmem:[#allocation7 + $0x18] sm:$0xff] }
  0x39   :  { %280 = vmatprep.subr.bf16.mxu0 %v112_v33  ;;  %v184_v9 = vpack.c.bf16 %v171_v8, %v170_v7  ;;  %v183_v12 = vpack.c.bf16 %v169_v11, %v168_v10  ;;  %v166_v13 = vld [vmem:[#allocation7] sm:$0xff]  ;;  %v167_v14 = vld [vmem:[#allocation7 + $0x8] sm:$0xff] }
  0x3a   :  { %v182_v15 = vpack.c.bf16 %v167_v14, %v166_v13  ;;  %v270_v20 = vld [vmem:[%s501_s2] ss:$0 sm:$0xff]  ;;  %s432_s2 = smov [#allocation8]  }
  0x3b   :  { %308 = vmatpush3.bf16.msra.mxu1 %v187_v49  ;;  %v271_v26 = vld [vmem:[%s503_s4] ss:$0 sm:$0xff]  ;;  %s257_s4 = sshll.u32 %s432_s2, 4  ;;  %s258_s4 = int_to_ptr.vmem [resolvable:$true] %s257_s4 }
  0x3c   :  { %281 = vmatpush3.bf16.msra.mxu0 %v104_v41  ;;  %309 = vmatprep.subr.bf16.mxu1 %v430_v0  ;;  %s397_s13 = scalar_lea.vmem %s258_s4, 256  ;;  %p402_p2 = scmp.lt.s32.totalorder %s258_s4, %s258_s4 }
  0x3d   :  { %282 = vmatprep.subr.bf16.mxu0 %v111_v44  ;;  %p398_p1 = scmp.ne.s32.totalorder %s258_s4, %s397_s13  ;;  %p403_p3 = scmp.lt.s32.totalorder %s397_s13, %s397_s13 }
  0x3f   :  { %310 = vmatpush3.bf16.msra.mxu1 %v186_v58  ;;  %p404_p4 = por %p403_p3, %p402_p2 }
  0x40   :  { %283 = vmatpush3.bf16.msra.mxu0 %v103_v50  ;;  %311 = vmatprep.subr.bf16.mxu1 %v430_v0 }
  0x41   :  { %284 = vmatprep.subr.bf16.mxu0 %v110_v53  ;;  %p405_p5 = pnand %p404_p4, %p398_p1 }
  0x43   :  { %312 = vmatpush3.bf16.msra.mxu1 %v185_v2 }
  0x44   :  { %285 = vmatpush3.bf16.msra.mxu0 %v102_v59  ;;  %313 = vmatprep.subr.bf16.mxu1 %v430_v0 }
  0x45   :  { %286 = vmatprep.subr.bf16.mxu0 %v109_v62 }
  0x47   :  { %314 = vmatpush3.bf16.msra.mxu1 %v184_v9 }
  0x48   :  { %287 = vmatpush3.bf16.msra.mxu0 %v101_v3  ;;  %315 = vmatprep.subr.bf16.mxu1 %v430_v0 }
  0x4b   :  { %157 = vmatmul.mubr.bf16.vlgmr.msra.gmra.mxu0 %v67_v6  ;;  %316 = vmatpush3.bf16.msra.mxu1 %v183_v12 }
  0x4c   :  { %317 = vmatprep.subr.bf16.mxu1 %v430_v0 }
  0x4f   :  { %318 = vmatpush3.bf16.msra.mxu1 %v182_v15 }
 0x10b   :  { %v288_v16 = vpop.f32.mrf.mxu0 }
 0x10d   :  { %v289_v17 = vpop.f32.mrf.mxu0 }
 0x10e   :  { %v290_v19 = vadd.f32 %v289_v17, %v288_v16 }
 0x10f   :  { %v291_v18 = vpop.f32.mrf.mxu0 }
 0x110   :  { %v159_v23 = vadd.f32 %v290_v19, %v270_v20 }
 0x111   :  { %v292_v21 = vpop.f32.mrf.mxu0 }
 0x112   :  { %v293_v22 = vadd.f32 %v292_v21, %v291_v18 }
 0x114   :  { %v162_v24 = vadd.f32 %v293_v22, %v270_v20 }
 0x116   :  { %v165_v25 = vpack.c.bf16 %v162_v24, %v159_v23 }
 0x118   :  { %320 = vmatmul.mubr.bf16.vlgmr.msra.gmra.mxu1 %v165_v25 }
 0x1d8   :  { %v231_v27 = vpop.f32.mrf.mxu1 }
 0x1d9   :  { %v232_v0 = vadd.f32 %v271_v26, %v231_v27 }
 0x1da   :  { %v321_v28 = vpop.f32.mrf.mxu1 }
 0x1db   :  { %v238_v29 = vmul.f32 %v232_v0, %v232_v0 }
 0x1dc   :  { %v234_v30 = vpop.f32.mrf.mxu1 }
 0x1dd   :  { %v235_v31 = vadd.f32 %v271_v26, %v234_v30  ;;  %240 = vadd.xlane.f32.xlu0 %v238_v29 }
 0x1de   :  { %v322_v32 = vpop.f32.mrf.mxu1 }
 0x1df   :  { %v239_v33 = vmul.f32 %v235_v31, %v235_v31 }
 0x1e1   :  { %242 = vadd.xlane.f32.xlu0 %v239_v33 }
 0x266   :  { %v241_v34 = vpop.xlane.xlu0 %240 }
 0x267   :  { %v244_v35 = vmax.f32 %v241_v34, 1e-24 }
 0x269   :  { %333 = vrsqrt.f32 %v244_v35 }
 0x26a   :  { %v243_v36 = vpop.xlane.xlu0 %242 }
 0x26b   :  { %v245_v37 = vmax.f32 %v243_v36, 1e-24 }
 0x26d   :  { %335 = vrsqrt.f32 %v245_v37 }
 0x276   :  { %v334_v38 = vpop.eup %333 }
 0x277   :  { %v248_v39 = vmul.f32 %v334_v38, %v232_v0 }
 0x279   :  { %250 = vst [vmem:[#allocation8] sm:$0xff] %v248_v39 }
 0x27a   :  { %v336_v40 = vpop.eup %335 }
 0x27b   :  { %v249_v41 = vmul.f32 %v336_v40, %v235_v31 }
 0x27d   :  { %251 = vst [vmem:[#allocation8 + $0x8] sm:$0xff] %v249_v41 }
 0x27e   :  { %408 = shalt.err (!%p405_p5)
}
 0x27f   :  { %263 = dma.vmem_to_hbm [thread:$0]  %s258_s4, 256, %s504_s5, [#allocation4], %s424_s21, %s424_s21, %s425_s22  }
 0x280   :  { %421 = dma.done.wait [#allocation4], 256  }
 0x281   :  { %422 = vsyncadd [#allocation4], 4294967040 }
 0x282   :  { %267 = vsyncpa [#allocation3], 1 }
 0x283   :  { %268 = vsyncpa [#allocation6], 1 }
 0x284   :  { %269 = vsyncpa [#allocation4], 1 }

</bundles_post_ra>
